<compile_context>
chip_gen: v7x
topology: tpu7x:2x2x1
jax: 0.10.0
libtpu: 0.0.40
codegen_flags: <defaults>
</compile_context>

<pallas_src>
import jax
import jax.numpy as jnp
from jax.experimental import pallas as pl
from jax.experimental.pallas import tpu as pltpu


# ---------------------------------------------------------------------------
# Model configuration (matches the PyTorch module).
# ---------------------------------------------------------------------------
CONV_CFG = [  # (cin, cout, ks, stride, pad)
    (1, 8, 5, 2, 2),
    (8, 16, 3, 2, 1),
    (16, 32, 3, 2, 1),
    (32, 64, 3, 2, 1),
]
IN_HW = 16
NUM_CLASSES = 10
LANE = 128          # TPU lane width; tail layers are zero-padded to this.
TB = 256            # batch tile for the gridded large-batch path (128 on v5e)


# ---------------------------------------------------------------------------
# Pallas kernel: fully fused forward pass.  Activations never leave VMEM;
# matmuls take bf16 operands with f32 accumulation, bias/ReLU run in f32.
# ---------------------------------------------------------------------------
def _fused_kernel(x_ref, t1_ref, b1_ref, t2_ref, b2_ref, t3_ref, b3_ref,
                  t4_ref, b4_ref, w5_ref, b5_ref, o_ref):
    def dense(a_bf16, w_ref, b_ref, relu):
        y = jnp.dot(a_bf16, w_ref[...], preferred_element_type=jnp.float32)
        y = y + b_ref[...]          # (1, N) f32 bias row broadcasts over rows
        return jnp.maximum(y, 0.0) if relu else y

    a = x_ref[...]                                               # [B, 256] bf16
    a = dense(a, t1_ref, b1_ref, True).astype(jnp.bfloat16)      # [B, 512]
    a = dense(a, t2_ref, b2_ref, True).astype(jnp.bfloat16)      # [B, 256]
    a = dense(a, t3_ref, b3_ref, True).astype(jnp.bfloat16)      # [B, 128]
    a = dense(a, t4_ref, b4_ref, True).astype(jnp.bfloat16)      # [B, 128] (64 real)
    o_ref[...] = dense(a, w5_ref, b5_ref, False).astype(o_ref.dtype)  # [B, 128]


def _full_block(shape):
    ndim = len(shape)
    return pl.BlockSpec(shape, lambda: (0,) * ndim)


# ---------------------------------------------------------------------------
# Init-time parameter preparation (NOT in the per-forward hot path).
# Fold each Conv2d into a dense [H*W*Cin, OH*OW*Cout] matrix acting on
# (h, w, cin)-flattened activations, plus a pre-broadcast bias row.
# ---------------------------------------------------------------------------
def _conv_layer_to_dense(w_oihw, b, H, W, stride, pad):
    Cout, Cin, KH, KW = w_oihw.shape
    N = H * W * Cin
    basis = jnp.eye(N, dtype=jnp.float32).reshape(N, H, W, Cin)
    basis = jnp.transpose(basis, (0, 3, 1, 2))                    # [N, Cin, H, W]
    out = jax.lax.conv_general_dilated(
        basis, w_oihw.astype(jnp.float32), (stride, stride),
        [(pad, pad), (pad, pad)],
        dimension_numbers=("NCHW", "OIHW", "NCHW"))               # [N, Cout, OH, OW]
    _, _, OH, OW = out.shape
    T = jnp.transpose(out, (0, 2, 3, 1)).reshape(N, OH * OW * Cout)
    b_row = jnp.broadcast_to(b.astype(jnp.float32), (OH * OW, Cout))
    b_row = b_row.reshape(1, OH * OW * Cout)
    return T, b_row, OH, OW


def prepare_params(conv_params, lin_params):
    """One-time prep: bf16 dense conv matrices (tail lane-padded to 128),
    f32 bias rows, lane-padded pre-transposed bf16 linear weight."""
    H = W = IN_HW
    prepped = []
    for idx, ((w, b), (_cin, _cout, _ks, s, p)) in enumerate(zip(conv_params, CONV_CFG)):
        T, b_row, H, W = _conv_layer_to_dense(w, b, H, W, s, p)
        if idx == len(CONV_CFG) - 1:
            # Lane-pad 64 -> 128 output channels.  Exact: padded columns of T
            # and b are zero, ReLU(0)=0, and padded W5 rows are zero below.
            n = T.shape[1]
            T = jnp.pad(T, ((0, 0), (0, LANE - n)))
            b_row = jnp.pad(b_row, ((0, 0), (0, LANE - n)))
        prepped.append((T.astype(jnp.bfloat16), b_row.astype(jnp.float32)))

    lw, lb = lin_params                                           # [10, 64], [10]
    w5 = jnp.transpose(lw).astype(jnp.float32)                    # [64, 10]
    w5 = jnp.pad(w5, ((0, LANE - w5.shape[0]), (0, LANE - w5.shape[1])))
    b5 = jnp.pad(lb.reshape(1, -1).astype(jnp.float32),
                 ((0, 0), (0, LANE - NUM_CLASSES)))
    prepped.append((w5.astype(jnp.bfloat16), b5))
    return tuple(prepped)


# ---------------------------------------------------------------------------
# Parameters (deterministic, PyTorch-like uniform(-1/sqrt(fan_in), ...) init).
# ---------------------------------------------------------------------------
def init_params(key):
    conv_params = []
    for (cin, cout, ks, _, _) in CONV_CFG:
        key, kw_, kb_ = jax.random.split(key, 3)
        bound = 1.0 / (cin * ks * ks) ** 0.5
        w = jax.random.uniform(kw_, (cout, cin, ks, ks), jnp.float32, -bound, bound)
        b = jax.random.uniform(kb_, (cout,), jnp.float32, -bound, bound)
        conv_params.append((w, b))
    key, kw_, kb_ = jax.random.split(key, 3)
    bound = 1.0 / 64.0 ** 0.5
    lw = jax.random.uniform(kw_, (NUM_CLASSES, 64), jnp.float32, -bound, bound)
    lb = jax.random.uniform(kb_, (NUM_CLASSES,), jnp.float32, -bound, bound)
    return conv_params, (lw, lb)


# ---------------------------------------------------------------------------
# Forward pass: flatten + one pallas_call (+ final [:B, :10] slice).
# ---------------------------------------------------------------------------
@jax.jit
def forward(x_nchw, prepped):
    B, C, H, W = x_nchw.shape
    # Explicit NCHW->NHWC so the (h, w, cin) flattening matches the Toeplitz
    # matrices for any Cin (here Cin == 1).
    x2d = jnp.transpose(x_nchw, (0, 2, 3, 1)).reshape(B, H * W * C)
    x2d = x2d.astype(jnp.bfloat16)

    use_grid = B >= TB
    if use_grid:
        Bp = TB * pl.cdiv(B, TB)
    else:
        Bp = ((B + 7) // 8) * 8        # sublane-pad small batches
    if Bp != B:
        x2d = jnp.pad(x2d, ((0, Bp - B), (0, 0)))

    operands = [x2d]
    for mat, bias in prepped:
        operands.extend([mat, bias])

    # Advisory cost estimate (weights counted once; x/out once).
    flops = 2 * Bp * sum(int(m.shape[0]) * int(m.shape[1]) for m, _ in prepped)
    bytes_accessed = (sum(m.size * m.dtype.itemsize + b.size * b.dtype.itemsize
                          for m, b in prepped)
                      + x2d.size * x2d.dtype.itemsize + Bp * LANE * 4)
    cost = pl.CostEstimate(flops=flops, transcendentals=0,
                           bytes_accessed=bytes_accessed)

    if use_grid:
        # Batch-tiled path: MXU-sized x/out tiles; weights/biases use a
        # constant block index so they stay VMEM-resident across grid steps.
        in_specs = [pl.BlockSpec((TB, x2d.shape[1]), lambda i: (i, 0))]
        for mat, bias in prepped:
            in_specs.append(pl.BlockSpec(mat.shape, lambda i: (0, 0)))
            in_specs.append(pl.BlockSpec(bias.shape, lambda i: (0, 0)))
        out = pl.pallas_call(
            _fused_kernel,
            out_shape=jax.ShapeDtypeStruct((Bp, LANE), jnp.float32),
            grid=(Bp // TB,),
            in_specs=in_specs,
            out_specs=pl.BlockSpec((TB, LANE), lambda i: (i, 0)),
            compiler_params=pltpu.CompilerParams(
                dimension_semantics=("parallel",)),   # uses both TCs on v7x
            cost_estimate=cost,
        )(*operands)
    else:
        # Tiny-batch path: whole problem in one grid-less invocation
        # (a grid would cost more in per-step overhead than the kernel).
        out = pl.pallas_call(
            _fused_kernel,
            out_shape=jax.ShapeDtypeStruct((Bp, LANE), jnp.float32),
            in_specs=[_full_block(op.shape) for op in operands],
            out_specs=_full_block((Bp, LANE)),
            cost_estimate=cost,
        )(*operands)

    return out[:B, :NUM_CLASSES]


# ---------------------------------------------------------------------------
# Pure-JAX reference (direct translation of the PyTorch forward), all f32.
# ---------------------------------------------------------------------------
def ref_forward(x_nchw, conv_params, lin_params):
    y = x_nchw
    for (w, b), (_, _, _, s, p) in zip(conv_params, CONV_CFG):
        y = jax.lax.conv_general_dilated(
            y, w, (s, s), [(p, p), (p, p)],
            dimension_numbers=("NCHW", "OIHW", "NCHW"))
        y = jnp.maximum(y + b[None, :, None, None], 0.0)
    y = y.reshape(y.shape[0], -1)
    lw, lb = lin_params
    return y @ lw.T + lb


if __name__ == "__main__":
    key = jax.random.PRNGKey(0)
    key, kparams, kx1, kx2 = jax.random.split(key, 4)
    conv_params, lin_params = init_params(kparams)
    prepped = prepare_params(conv_params, lin_params)   # one-time, off hot path

    # bf16 weights -> loosened tolerance vs the f32 reference.
    RTOL, ATOL = 2e-2, 2e-2

    # 1) Tiny-batch path (grid-less): batch=2, 1 channel, 16x16 "spectrogram".
    x_small = jax.random.normal(kx1, (2, 1, IN_HW, IN_HW), jnp.float32)
    out_small = jax.block_until_ready(forward(x_small, prepped))
    assert out_small.shape == (2, NUM_CLASSES), out_small.shape
    ref_small = ref_forward(x_small, conv_params, lin_params)
    assert jnp.allclose(out_small, ref_small, rtol=RTOL, atol=ATOL), (
        "Pallas output mismatch vs JAX reference (small batch)")

    # 2) Batch-tiled path (grid over batch, weights VMEM-resident): batch=300.
    x_big = jax.random.normal(kx2, (300, 1, IN_HW, IN_HW), jnp.float32)
    out_big = jax.block_until_ready(forward(x_big, prepped))
    assert out_big.shape == (300, NUM_CLASSES), out_big.shape
    ref_big = ref_forward(x_big, conv_params, lin_params)
    assert jnp.allclose(out_big, ref_big, rtol=RTOL, atol=ATOL), (
        "Pallas output mismatch vs JAX reference (large batch)")

    print("KERNEL_OK")
</pallas_src>

<mosaic_0001>
module attributes {stable_mosaic.version = 11 : i64} {
  func.func @_fused_kernel(%arg0: memref<8x256xbf16, #tpu.memory_space<vmem>>, %arg1: memref<256x512xbf16, #tpu.memory_space<vmem>>, %arg2: memref<1x512xf32, #tpu.memory_space<vmem>>, %arg3: memref<512x256xbf16, #tpu.memory_space<vmem>>, %arg4: memref<1x256xf32, #tpu.memory_space<vmem>>, %arg5: memref<256x128xbf16, #tpu.memory_space<vmem>>, %arg6: memref<1x128xf32, #tpu.memory_space<vmem>>, %arg7: memref<128x128xbf16, #tpu.memory_space<vmem>>, %arg8: memref<1x128xf32, #tpu.memory_space<vmem>>, %arg9: memref<128x128xbf16, #tpu.memory_space<vmem>>, %arg10: memref<1x128xf32, #tpu.memory_space<vmem>>, %arg11: memref<8x128xf32, #tpu.memory_space<vmem>>) attributes {dimension_semantics = [], scalar_prefetch = 0 : i64, scratch_operands = 0 : i64, tpu.core_type = #tpu.core_type<tc>} {
    %c0 = arith.constant 0 : index
    %c0_0 = arith.constant 0 : index
    %0 = vector.load %arg0[%c0, %c0_0] : memref<8x256xbf16, #tpu.memory_space<vmem>>, vector<8x256xbf16>
    %c0_1 = arith.constant 0 : index
    %c0_2 = arith.constant 0 : index
    %1 = vector.load %arg1[%c0_1, %c0_2] : memref<256x512xbf16, #tpu.memory_space<vmem>>, vector<256x512xbf16>
    %cst = arith.constant dense<0.000000e+00> : vector<8x512xf32>
    %2 = tpu.matmul %0, %1, %cst {dimension_numbers = #tpu.dot_dimension_numbers<[1], [0], [0], [1], [0, 0, 1, 1], [], []>} : vector<8x256xbf16>, vector<256x512xbf16>, vector<8x512xf32> -> vector<8x512xf32>
    %c0_3 = arith.constant 0 : index
    %c0_4 = arith.constant 0 : index
    %3 = vector.load %arg2[%c0_3, %c0_4] : memref<1x512xf32, #tpu.memory_space<vmem>>, vector<1x512xf32>
    %4 = vector.broadcast %3 : vector<1x512xf32> to vector<8x512xf32>
    %5 = arith.addf %2, %4 : vector<8x512xf32>
    %cst_5 = arith.constant 0.000000e+00 : f32
    %6 = vector.broadcast %cst_5 : f32 to vector<8x512xf32>
    %7 = arith.maximumf %5, %6 : vector<8x512xf32>
    %8 = arith.truncf %7 : vector<8x512xf32> to vector<8x512xbf16>
    %c0_6 = arith.constant 0 : index
    %c0_7 = arith.constant 0 : index
    %9 = vector.load %arg3[%c0_6, %c0_7] : memref<512x256xbf16, #tpu.memory_space<vmem>>, vector<512x256xbf16>
    %cst_8 = arith.constant dense<0.000000e+00> : vector<8x256xf32>
    %10 = tpu.matmul %8, %9, %cst_8 {dimension_numbers = #tpu.dot_dimension_numbers<[1], [0], [0], [1], [0, 0, 1, 1], [], []>} : vector<8x512xbf16>, vector<512x256xbf16>, vector<8x256xf32> -> vector<8x256xf32>
    %c0_9 = arith.constant 0 : index
    %c0_10 = arith.constant 0 : index
    %11 = vector.load %arg4[%c0_9, %c0_10] : memref<1x256xf32, #tpu.memory_space<vmem>>, vector<1x256xf32>
    %12 = vector.broadcast %11 : vector<1x256xf32> to vector<8x256xf32>
    %13 = arith.addf %10, %12 : vector<8x256xf32>
    %cst_11 = arith.constant 0.000000e+00 : f32
    %14 = vector.broadcast %cst_11 : f32 to vector<8x256xf32>
    %15 = arith.maximumf %13, %14 : vector<8x256xf32>
    %16 = arith.truncf %15 : vector<8x256xf32> to vector<8x256xbf16>
    %c0_12 = arith.constant 0 : index
    %c0_13 = arith.constant 0 : index
    %17 = vector.load %arg5[%c0_12, %c0_13] : memref<256x128xbf16, #tpu.memory_space<vmem>>, vector<256x128xbf16>
    %cst_14 = arith.constant dense<0.000000e+00> : vector<8x128xf32>
    %18 = tpu.matmul %16, %17, %cst_14 {dimension_numbers = #tpu.dot_dimension_numbers<[1], [0], [0], [1], [0, 0, 1, 1], [], []>} : vector<8x256xbf16>, vector<256x128xbf16>, vector<8x128xf32> -> vector<8x128xf32>
    %c0_15 = arith.constant 0 : index
    %c0_16 = arith.constant 0 : index
    %19 = vector.load %arg6[%c0_15, %c0_16] : memref<1x128xf32, #tpu.memory_space<vmem>>, vector<1x128xf32>
    %20 = vector.broadcast %19 : vector<1x128xf32> to vector<8x128xf32>
    %21 = arith.addf %18, %20 : vector<8x128xf32>
    %cst_17 = arith.constant 0.000000e+00 : f32
    %22 = vector.broadcast %cst_17 : f32 to vector<8x128xf32>
    %23 = arith.maximumf %21, %22 : vector<8x128xf32>
    %24 = arith.truncf %23 : vector<8x128xf32> to vector<8x128xbf16>
    %c0_18 = arith.constant 0 : index
    %c0_19 = arith.constant 0 : index
    %25 = vector.load %arg7[%c0_18, %c0_19] : memref<128x128xbf16, #tpu.memory_space<vmem>>, vector<128x128xbf16>
    %cst_20 = arith.constant dense<0.000000e+00> : vector<8x128xf32>
    %26 = tpu.matmul %24, %25, %cst_20 {dimension_numbers = #tpu.dot_dimension_numbers<[1], [0], [0], [1], [0, 0, 1, 1], [], []>} : vector<8x128xbf16>, vector<128x128xbf16>, vector<8x128xf32> -> vector<8x128xf32>
    %c0_21 = arith.constant 0 : index
    %c0_22 = arith.constant 0 : index
    %27 = vector.load %arg8[%c0_21, %c0_22] : memref<1x128xf32, #tpu.memory_space<vmem>>, vector<1x128xf32>
    %28 = vector.broadcast %27 : vector<1x128xf32> to vector<8x128xf32>
    %29 = arith.addf %26, %28 : vector<8x128xf32>
    %cst_23 = arith.constant 0.000000e+00 : f32
    %30 = vector.broadcast %cst_23 : f32 to vector<8x128xf32>
    %31 = arith.maximumf %29, %30 : vector<8x128xf32>
    %32 = arith.truncf %31 : vector<8x128xf32> to vector<8x128xbf16>
    %c0_24 = arith.constant 0 : index
    %c0_25 = arith.constant 0 : index
    %33 = vector.load %arg9[%c0_24, %c0_25] : memref<128x128xbf16, #tpu.memory_space<vmem>>, vector<128x128xbf16>
    %cst_26 = arith.constant dense<0.000000e+00> : vector<8x128xf32>
    %34 = tpu.matmul %32, %33, %cst_26 {dimension_numbers = #tpu.dot_dimension_numbers<[1], [0], [0], [1], [0, 0, 1, 1], [], []>} : vector<8x128xbf16>, vector<128x128xbf16>, vector<8x128xf32> -> vector<8x128xf32>
    %c0_27 = arith.constant 0 : index
    %c0_28 = arith.constant 0 : index
    %35 = vector.load %arg10[%c0_27, %c0_28] : memref<1x128xf32, #tpu.memory_space<vmem>>, vector<1x128xf32>
    %36 = vector.broadcast %35 : vector<1x128xf32> to vector<8x128xf32>
    %37 = arith.addf %34, %36 : vector<8x128xf32>
    %c0_29 = arith.constant 0 : index
    %c0_30 = arith.constant 0 : index
    %38 = vector.load %arg11[%c0_29, %c0_30] : memref<8x128xf32, #tpu.memory_space<vmem>>, vector<8x128xf32>
    tpu.vector_store %arg11[%c0_29, %c0_30], %37 {strides = array<i32>} : memref<8x128xf32, #tpu.memory_space<vmem>>, vector<8x128xf32>,
    return
  }
}

</mosaic_0001>

<bundles_post_ra>
// kernel: forward.1
= control target key start
LH: loop header
LB: loop body
LE: loop exit
PB: predicated region body
PF: predicated region fallthrough
CT: control target
= control target key end

     0   :  { %16 = vsyncpa [#allocation3], 0  ;;  %s2281_s0 = inlined_call_operand.vmem [shape: bf16[8,256], index: 0, kind: input, shape index: {}]   ;;  %s2282_s1 = inlined_call_operand.hbm [shape: bf16[256,512], index: 1, kind: input, shape index: {}]   ;;  %s2283_s2 = inlined_call_operand.vmem [shape: f32[1,512], index: 2, kind: input, shape index: {}]   ;;  %s2284_s3 = inlined_call_operand.hbm [shape: bf16[512,256], index: 3, kind: input, shape index: {}]   ;;  %s2285_s4 = inlined_call_operand.vmem [shape: f32[1,256], index: 4, kind: input, shape index: {}]   ;;  %s2286_s5 = inlined_call_operand.hbm [shape: bf16[256,128], index: 5, kind: input, shape index: {}]   ;;  %s2287_s6 = inlined_call_operand.vmem [shape: f32[1,128], index: 6, kind: input, shape index: {}]   ;;  %s2288_s7 = inlined_call_operand.vmem [shape: bf16[128,128], index: 7, kind: input, shape index: {}]   ;;  %s2289_s8 = inlined_call_operand.vmem [shape: f32[1,128], index: 8, kind: input, shape index: {}]   ;;  %s2290_s9 = inlined_call_operand.hbm [shape: bf16[128,128], index: 9, kind: input, shape index: {}]   ;;  %s2291_s10 = inlined_call_operand.vmem [shape: f32[1,128], index: 10, kind: input, shape index: {}]   ;;  %s2292_s11 = inlined_call_operand.vmem [shape: f32[8,128], index: 11, kind: output, shape index: {}]  }
   0x1   :  { %17 = vsyncpa [#allocation5], 0 }
   0x2   :  { %18 = vsyncpa [#allocation8], 0  ;;  %s2072_s17 = smov [#allocation4]   ;;  %s1978_s21 = scalar_lea.hbm %s2284_s3, 8192 }
   0x3   :  { %s40_s18 = sshll.u32 %s2072_s17, 4  ;;  %p1979_p0 = scmp.ne.s32.totalorder %s2284_s3, %s1978_s21  ;;  %s41_s18 = int_to_ptr.vmem [resolvable:$true] %s40_s18 }
   0x4   :  { %p1982_p1 = scmp.lt.u32.totalorder %s1978_s21, %s2284_s3 }
   0x6   :  { %p1984_p2 = pnand %p1982_p1, %p1979_p0 }
   0x8   :  { %1987 = shalt.err (!%p1984_p2)
}
   0x9   :  { %s1988_s26 = scalar_lea.vmem %s41_s18, 8192  ;;  %p1993_p4 = scmp.lt.s32.totalorder %s41_s18, %s41_s18 }
   0xa   :  { %p1989_p3 = scmp.ne.s32.totalorder %s41_s18, %s1988_s26  ;;  %p1994_p5 = scmp.lt.s32.totalorder %s1988_s26, %s1988_s26 }
   0xc   :  { %p1995_p6 = por %p1994_p5, %p1993_p4 }
   0xe   :  { %p1996_p7 = pnand %p1995_p6, %p1989_p3 }
  0x10   :  { %1999 = shalt.err (!%p1996_p7)
}
  0x11   :  { %s2073_s27 = smov 128   ;;  %s2074_s28 = smov 8  }
  0x12   :  { %46 = dma.hbm_to_vmem [thread:$0]  %s2284_s3, 8192, %s41_s18, [#allocation5], %s2073_s27, %s2073_s27, %s2074_s28  }
  0x13   :  { %s2075_s12 = smov [#allocation2]   ;;  %s2000_s16 = scalar_lea.hbm %s2282_s1, 8192 }
  0x14   :  { %s26_s13 = sshll.u32 %s2075_s12, 4  ;;  %p2001_p8 = scmp.ne.s32.totalorder %s2282_s1, %s2000_s16  ;;  %s27_s13 = int_to_ptr.vmem [resolvable:$true] %s26_s13 }
  0x15   :  { %p2004_p9 = scmp.lt.u32.totalorder %s2000_s16, %s2282_s1 }
  0x17   :  { %p2006_p10 = pnand %p2004_p9, %p2001_p8 }
  0x19   :  { %2009 = shalt.err (!%p2006_p10)
}
  0x1a   :  { %s2010_s22 = scalar_lea.vmem %s27_s13, 8192  ;;  %p2015_p12 = scmp.lt.s32.totalorder %s27_s13, %s27_s13 }
  0x1b   :  { %p2011_p11 = scmp.ne.s32.totalorder %s27_s13, %s2010_s22  ;;  %p2016_p13 = scmp.lt.s32.totalorder %s2010_s22, %s2010_s22 }
  0x1d   :  { %p2017_p0 = por %p2016_p13, %p2015_p12 }
  0x1f   :  { %p2018_p1 = pnand %p2017_p0, %p2011_p11 }
  0x21   :  { %2021 = shalt.err (!%p2018_p1)
}
  0x22   :  { %s2076_s3 = smov 256   ;;  %s2077_s18 = smov 16  }
  0x23   :  { %32 = dma.hbm_to_vmem [thread:$0]  %s2282_s1, 8192, %s27_s13, [#allocation3], %s2076_s3, %s2076_s3, %s2077_s18  }
  0x24   :  { %s2078_s25 = smov [#allocation6]   ;;  %s2022_s29 = scalar_lea.hbm %s2286_s5, 2048 }
  0x25   :  { %s54_s26 = sshll.u32 %s2078_s25, 4  ;;  %p2023_p2 = scmp.ne.s32.totalorder %s2286_s5, %s2022_s29  ;;  %s55_s26 = int_to_ptr.vmem [resolvable:$true] %s54_s26 }
  0x26   :  { %p2026_p3 = scmp.lt.u32.totalorder %s2022_s29, %s2286_s5 }
  0x28   :  { %p2028_p4 = pnand %p2026_p3, %p2023_p2 }
  0x2a   :  { %2031 = shalt.err (!%p2028_p4)
}
  0x2b   :  { %s2032_s16 = scalar_lea.vmem %s55_s26, 2048  ;;  %p2037_p6 = scmp.lt.s32.totalorder %s55_s26, %s55_s26 }
  0x2c   :  { %p2033_p5 = scmp.ne.s32.totalorder %s55_s26, %s2032_s16  ;;  %p2038_p7 = scmp.lt.s32.totalorder %s2032_s16, %s2032_s16 }
  0x2e   :  { %p2039_p8 = por %p2038_p7, %p2037_p6 }
  0x30   :  { %p2040_p9 = pnand %p2039_p8, %p2033_p5 }
  0x32   :  { %2043 = shalt.err (!%p2040_p9)
}
  0x33   :  { %s2079_s1 = smov 64   ;;  %s2080_s13 = smov 4  }
  0x34   :  { %60 = dma.hbm_to_vmem [thread:$0]  %s2286_s5, 2048, %s55_s26, [#allocation5], %s2079_s1, %s2079_s1, %s2080_s13  }
  0x35   :  { %s2081_s20 = smov [#allocation7]   ;;  %s2044_s18 = scalar_lea.hbm %s2290_s9, 1024 }
  0x36   :  { %s72_s21 = sshll.u32 %s2081_s20, 4  ;;  %p2045_p10 = scmp.ne.s32.totalorder %s2290_s9, %s2044_s18  ;;  %s73_s21 = int_to_ptr.vmem [resolvable:$true] %s72_s21 }
  0x37   :  { %p2048_p11 = scmp.lt.u32.totalorder %s2044_s18, %s2290_s9 }
  0x39   :  { %p2050_p12 = pnand %p2048_p11, %p2045_p10 }
  0x3b   :  { %2053 = shalt.err (!%p2050_p12)
}
  0x3c   :  { %s2054_s28 = scalar_lea.vmem %s73_s21, 1024  ;;  %p2059_p0 = scmp.lt.s32.totalorder %s73_s21, %s73_s21 }
  0x3d   :  { %p2055_p13 = scmp.ne.s32.totalorder %s73_s21, %s2054_s28  ;;  %p2060_p1 = scmp.lt.s32.totalorder %s2054_s28, %s2054_s28 }
  0x3f   :  { %p2061_p2 = por %p2060_p1, %p2059_p0 }
  0x41   :  { %p2062_p3 = pnand %p2061_p2, %p2055_p13 }
  0x43   :  { %2065 = shalt.err (!%p2062_p3)
}
  0x44   :  { %78 = dma.hbm_to_vmem [thread:$0]  %s2290_s9, 1024, %s73_s21, [#allocation8], %s2079_s1, %s2079_s1, %s2080_s13  }
  0x45   :  { %2066 = dma.done.wait [#allocation3], 8192  }
  0x46   :  { %2067 = vsyncadd [#allocation3], 4294959104 }
  0x47   :  { %2068 = dma.done.wait [#allocation5], 10240  }
  0x48   :  { %2069 = vsyncadd [#allocation5], 4294957056 }
  0x49   :  { %2070 = dma.done.wait [#allocation8], 1024  }
  0x4a   :  { %2071 = vsyncadd [#allocation8], 4294966272  ;;  %v1752_v0 = vld [vmem:[#allocation2 + $0x4] ss:$16 sps:$4 sm:$0xff]   ;;  %v1754_v1 = vld [vmem:[#allocation2] ss:$16 sps:$4 sm:$0xff]  }
  0x4b   :  { %508 = vmatprep.subr.bf16.mxu0 %v1752_v0  ;;  %v1755_v2 = vld [vmem:[#allocation2 + $0x24] ss:$16 sps:$4 sm:$0xff]   ;;  %v1757_v3 = vld [vmem:[#allocation2 + $0x20] ss:$16 sps:$4 sm:$0xff]   ;;  %v1799_v14 = vld [vmem:[#allocation2 + $0xc] ss:$16 sps:$4 sm:$0xff]  }
  0x4c   :  { %509 = vmatpush1.bf16.msra.mxu0 %v1754_v1  ;;  %v1758_v4 = vld [vmem:[#allocation2 + $0x44] ss:$16 sps:$4 sm:$0xff]   ;;  %v1760_v5 = vld [vmem:[#allocation2 + $0x40] ss:$16 sps:$4 sm:$0xff]   ;;  %v1802_v16 = vld [vmem:[#allocation2 + $0x8] ss:$16 sps:$4 sm:$0xff]   ;;  %549 = vmatprep.subr.bf16.mxu1 %v1799_v14 }
  0x4d   :  { %510 = vmatprep.subr.bf16.mxu0 %v1755_v2  ;;  %v1761_v6 = vld [vmem:[#allocation2 + $0x64] ss:$16 sps:$4 sm:$0xff]   ;;  %v1763_v7 = vld [vmem:[#allocation2 + $0x60] ss:$16 sps:$4 sm:$0xff]   ;;  %v1805_v19 = vld [vmem:[#allocation2 + $0x2c] ss:$16 sps:$4 sm:$0xff]   ;;  %550 = vmatpush1.bf16.msra.mxu1 %v1802_v16 }
  0x4e   :  { %v1764_v8 = vld [vmem:[#allocation2 + $0x84] ss:$16 sps:$4 sm:$0xff]   ;;  %v1766_v9 = vld [vmem:[#allocation2 + $0x80] ss:$16 sps:$4 sm:$0xff]   ;;  %v1807_v20 = vld [vmem:[#allocation2 + $0x28] ss:$16 sps:$4 sm:$0xff]   ;;  %551 = vmatprep.subr.bf16.mxu1 %v1805_v19 }
  0x4f   :  { %v1767_v10 = vld [vmem:[#allocation2 + $0xa4] ss:$16 sps:$4 sm:$0xff]   ;;  %v1769_v11 = vld [vmem:[#allocation2 + $0xa0] ss:$16 sps:$4 sm:$0xff]   ;;  %v1808_v21 = vld [vmem:[#allocation2 + $0x4c] ss:$16 sps:$4 sm:$0xff]  }
  0x50   :  { %511 = vmatpush1.bf16.msra.mxu0 %v1757_v3  ;;  %v1770_v12 = vld [vmem:[#allocation2 + $0xc4] ss:$16 sps:$4 sm:$0xff]   ;;  %v1772_v13 = vld [vmem:[#allocation2 + $0xc0] ss:$16 sps:$4 sm:$0xff]   ;;  %v1810_v24 = vld [vmem:[#allocation2 + $0x48] ss:$16 sps:$4 sm:$0xff]  }
  0x51   :  { %512 = vmatprep.subr.bf16.mxu0 %v1758_v4  ;;  %v1773_v15 = vld [vmem:[#allocation2 + $0xe4] ss:$16 sps:$4 sm:$0xff]   ;;  %v1775_v22 = vld [vmem:[#allocation2 + $0xe0] ss:$16 sps:$4 sm:$0xff]   ;;  %552 = vmatpush1.bf16.msra.mxu1 %v1807_v20  ;;  %v1811_v25 = vld [vmem:[#allocation2 + $0x6c] ss:$16 sps:$4 sm:$0xff]  }
  0x52   :  { %v2195_v17 = vld [vmem:[%s2281_s0] sm:$0xff]  ;;  %553 = vmatprep.subr.bf16.mxu1 %v1808_v21  ;;  %v1813_v28 = vld [vmem:[#allocation2 + $0x68] ss:$16 sps:$4 sm:$0xff]   ;;  %v1814_v29 = vld [vmem:[#allocation2 + $0x8c] ss:$16 sps:$4 sm:$0xff]   ;;  %vm2083_vm0 = vmmov 0  }
  0x53   :  { %v1490_v18 = vcombine.high %v2195_v17, %v2195_v17  ;;  %v1776_v23 = vld [vmem:[#allocation2 + $0x104] ss:$16 sps:$4 sm:$0xff]   ;;  %v1778_v26 = vld [vmem:[#allocation2 + $0x100] ss:$16 sps:$4 sm:$0xff]   ;;  %v1816_v32 = vld [vmem:[#allocation2 + $0x88] ss:$16 sps:$4 sm:$0xff]   ;;  %v1489_v59 = vcombine.low %v2195_v17, %v2195_v17 }
  0x54   :  { %513 = vmatpush1.bf16.msra.mxu0 %v1760_v5  ;;  %v1779_v27 = vld [vmem:[#allocation2 + $0x124] ss:$16 sps:$4 sm:$0xff]   ;;  %v1781_v30 = vld [vmem:[#allocation2 + $0x120] ss:$16 sps:$4 sm:$0xff]   ;;  %v1817_v33 = vld [vmem:[#allocation2 + $0xac] ss:$16 sps:$4 sm:$0xff]  }
  0x55   :  { %514 = vmatprep.subr.bf16.mxu0 %v1761_v6  ;;  %540 = vmatprep.mubr.bf16.mxu0 %v1490_v18  ;;  %v1782_v31 = vld [vmem:[#allocation2 + $0x144] ss:$16 sps:$4 sm:$0xff]   ;;  %v1784_v34 = vld [vmem:[#allocation2 + $0x140] ss:$16 sps:$4 sm:$0xff]   ;;  %v1819_v36 = vld [vmem:[#allocation2 + $0xa8] ss:$16 sps:$4 sm:$0xff]  }
  0x56   :  { %581 = vmatprep.mubr.bf16.mxu1 %v1490_v18  ;;  %554 = vmatpush1.bf16.msra.mxu1 %v1810_v24  ;;  %v1785_v35 = vld [vmem:[#allocation2 + $0x164] ss:$16 sps:$4 sm:$0xff]   ;;  %v1820_v37 = vld [vmem:[#allocation2 + $0xcc] ss:$16 sps:$4 sm:$0xff]   ;;  %v1787_v38 = vld [vmem:[#allocation2 + $0x160] ss:$16 sps:$4 sm:$0xff]  }
  0x57   :  { %555 = vmatprep.subr.bf16.mxu1 %v1811_v25  ;;  %v1788_v39 = vld [vmem:[#allocation2 + $0x184] ss:$16 sps:$4 sm:$0xff]   ;;  %v1822_v40 = vld [vmem:[#allocation2 + $0xc8] ss:$16 sps:$4 sm:$0xff]   ;;  %v1823_v41 = vld [vmem:[#allocation2 + $0xec] ss:$16 sps:$4 sm:$0xff]  }
  0x58   :  { %515 = vmatpush1.bf16.msra.mxu0 %v1763_v7  ;;  %v1790_v42 = vld [vmem:[#allocation2 + $0x180] ss:$16 sps:$4 sm:$0xff]   ;;  %v1791_v43 = vld [vmem:[#allocation2 + $0x1a4] ss:$16 sps:$4 sm:$0xff]   ;;  %v1825_v44 = vld [vmem:[#allocation2 + $0xe8] ss:$16 sps:$4 sm:$0xff]  }
  0x59   :  { %516 = vmatprep.subr.bf16.mxu0 %v1764_v8  ;;  %v1826_v45 = vld [vmem:[#allocation2 + $0x10c] ss:$16 sps:$4 sm:$0xff]   ;;  %v1793_v46 = vld [vmem:[#allocation2 + $0x1a0] ss:$16 sps:$4 sm:$0xff]   ;;  %v1794_v47 = vld [vmem:[#allocation2 + $0x1c4] ss:$16 sps:$4 sm:$0xff]  }
  0x5a   :  { %556 = vmatpush1.bf16.msra.mxu1 %v1813_v28  ;;  %v1828_v48 = vld [vmem:[#allocation2 + $0x108] ss:$16 sps:$4 sm:$0xff]   ;;  %v1829_v49 = vld [vmem:[#allocation2 + $0x12c] ss:$16 sps:$4 sm:$0xff]   ;;  %v1796_v50 = vld [vmem:[#allocation2 + $0x1c0] ss:$16 sps:$4 sm:$0xff]  }
  0x5b   :  { %557 = vmatprep.subr.bf16.mxu1 %v1814_v29  ;;  %v1797_v51 = vld [vmem:[#allocation2 + $0x1e4] ss:$16 sps:$4 sm:$0xff]   ;;  %v1831_v52 = vld [vmem:[#allocation2 + $0x128] ss:$16 sps:$4 sm:$0xff]   ;;  %v1832_v53 = vld [vmem:[#allocation2 + $0x14c] ss:$16 sps:$4 sm:$0xff]  }
  0x5c   :  { %517 = vmatpush1.bf16.msra.mxu0 %v1766_v9  ;;  %v1801_v54 = vld [vmem:[#allocation2 + $0x1e0] ss:$16 sps:$4 sm:$0xff]   ;;  %v1834_v55 = vld [vmem:[#allocation2 + $0x148] ss:$16 sps:$4 sm:$0xff]   ;;  %v1852_v56 = vld [vmem:[#allocation4 + $0x4] ss:$8 sps:$4 sm:$0xff]  }
  0x5d   :  { %518 = vmatprep.subr.bf16.mxu0 %v1767_v10  ;;  %v1835_v57 = vld [vmem:[#allocation2 + $0x16c] ss:$16 sps:$4 sm:$0xff]   ;;  %v1850_v58 = vld [vmem:[#allocation4] ss:$8 sps:$4 sm:$0xff]   ;;  %v1853_v63 = vld [vmem:[#allocation4 + $0x10] ss:$8 sps:$4 sm:$0xff]  }
  0x5e   :  { %558 = vmatpush1.bf16.msra.mxu1 %v1816_v32  ;;  %v1837_v60 = vld [vmem:[#allocation2 + $0x168] ss:$16 sps:$4 sm:$0xff]   ;;  %v1855_v61 = vld [vmem:[#allocation4 + $0x14] ss:$8 sps:$4 sm:$0xff]   ;;  %v1858_v1 = vld [vmem:[#allocation4 + $0x24] ss:$8 sps:$4 sm:$0xff]  }
  0x5f   :  { %559 = vmatprep.subr.bf16.mxu1 %v1817_v33  ;;  %v1838_v62 = vld [vmem:[#allocation2 + $0x18c] ss:$16 sps:$4 sm:$0xff]   ;;  %v1840_v0 = vld [vmem:[#allocation2 + $0x188] ss:$16 sps:$4 sm:$0xff]  }
  0x60   :  { %519 = vmatpush1.bf16.msra.mxu0 %v1769_v11  ;;  %v1841_v2 = vld [vmem:[#allocation2 + $0x1ac] ss:$16 sps:$4 sm:$0xff]   ;;  %v1856_v3 = vld [vmem:[#allocation4 + $0x20] ss:$8 sps:$4 sm:$0xff]   ;;  %v1859_v7 = vld [vmem:[#allocation4 + $0x30] ss:$8 sps:$4 sm:$0xff]  }
  0x61   :  { %520 = vmatprep.subr.bf16.mxu0 %v1770_v12  ;;  %v1843_v4 = vld [vmem:[#allocation2 + $0x1a8] ss:$16 sps:$4 sm:$0xff]   ;;  %v1861_v5 = vld [vmem:[#allocation4 + $0x34] ss:$8 sps:$4 sm:$0xff]   ;;  %v1864_v9 = vld [vmem:[#allocation4 + $0x44] ss:$8 sps:$4 sm:$0xff]  }
  0x62   :  { %560 = vmatpush1.bf16.msra.mxu1 %v1819_v36  ;;  %v1844_v6 = vld [vmem:[#allocation2 + $0x1cc] ss:$16 sps:$4 sm:$0xff]   ;;  %v1846_v8 = vld [vmem:[#allocation2 + $0x1c8] ss:$16 sps:$4 sm:$0xff]   ;;  %v1946_v36 = vld [vmem:[#allocation6 + $0x40] sm:$0xff]  }
  0x63   :  { %561 = vmatprep.subr.bf16.mxu1 %v1820_v37  ;;  %v1847_v10 = vld [vmem:[#allocation2 + $0x1ec] ss:$16 sps:$4 sm:$0xff]   ;;  %v1862_v11 = vld [vmem:[#allocation4 + $0x40] ss:$8 sps:$4 sm:$0xff]   ;;  %v1865_v14 = vld [vmem:[#allocation4 + $0x50] ss:$8 sps:$4 sm:$0xff]  }
  0x64   :  { %521 = vmatpush1.bf16.msra.mxu0 %v1772_v13  ;;  %v1849_v12 = vld [vmem:[#allocation2 + $0x1e8] ss:$16 sps:$4 sm:$0xff]   ;;  %v1867_v13 = vld [vmem:[#allocation4 + $0x54] ss:$8 sps:$4 sm:$0xff]   ;;  %v1876_v19 = vld [vmem:[#allocation4 + $0x84] ss:$8 sps:$4 sm:$0xff]  }
  0x65   :  { %522 = vmatprep.subr.bf16.mxu0 %v1773_v15  ;;  %v1870_v15 = vld [vmem:[#allocation4 + $0x64] ss:$8 sps:$4 sm:$0xff]   ;;  %v1868_v16 = vld [vmem:[#allocation4 + $0x60] ss:$8 sps:$4 sm:$0xff]   ;;  %v1873_v17 = vld [vmem:[#allocation4 + $0x74] ss:$8 sps:$4 sm:$0xff]  }
  0x66   :  { %562 = vmatpush1.bf16.msra.mxu1 %v1822_v40  ;;  %v1871_v18 = vld [vmem:[#allocation4 + $0x70] ss:$8 sps:$4 sm:$0xff]   ;;  %v1874_v20 = vld [vmem:[#allocation4 + $0x80] ss:$8 sps:$4 sm:$0xff]   ;;  %v1879_v21 = vld [vmem:[#allocation4 + $0x94] ss:$8 sps:$4 sm:$0xff]  }
  0x67   :  { %563 = vmatprep.subr.bf16.mxu1 %v1823_v41  ;;  %v1880_v24 = vld [vmem:[#allocation4 + $0xa0] ss:$8 sps:$4 sm:$0xff]   ;;  %v1885_v25 = vld [vmem:[#allocation4 + $0xb4] ss:$8 sps:$4 sm:$0xff]  }
  0x68   :  { %523 = vmatpush1.bf16.msra.mxu0 %v1775_v22  ;;  %v1877_v22 = vld [vmem:[#allocation4 + $0x90] ss:$8 sps:$4 sm:$0xff]   ;;  %v1886_v28 = vld [vmem:[#allocation4 + $0xc0] ss:$8 sps:$4 sm:$0xff]   ;;  %v1891_v29 = vld [vmem:[#allocation4 + $0xd4] ss:$8 sps:$4 sm:$0xff]  }
  0x69   :  { %524 = vmatprep.subr.bf16.mxu0 %v1776_v23  ;;  %v1882_v23 = vld [vmem:[#allocation4 + $0xa4] ss:$8 sps:$4 sm:$0xff]   ;;  %v1892_v32 = vld [vmem:[#allocation4 + $0xe0] ss:$8 sps:$4 sm:$0xff]   ;;  %v1897_v33 = vld [vmem:[#allocation4 + $0xf4] ss:$8 sps:$4 sm:$0xff]  }
  0x6a   :  { %564 = vmatpush1.bf16.msra.mxu1 %v1825_v44  ;;  %v1947_v37 = vld [vmem:[#allocation6] sm:$0xff]   ;;  %v1950_v40 = vld [vmem:[#allocation6 + $0x50] sm:$0xff]  }
  0x6b   :  { %565 = vmatprep.subr.bf16.mxu1 %v1826_v45  ;;  %v1951_v41 = vld [vmem:[#allocation6 + $0x10] sm:$0xff]   ;;  %v1954_v44 = vld [vmem:[#allocation6 + $0x60] sm:$0xff]  }
  0x6c   :  { %525 = vmatpush1.bf16.msra.mxu0 %v1778_v26  ;;  %v1883_v26 = vld [vmem:[#allocation4 + $0xb0] ss:$8 sps:$4 sm:$0xff]   ;;  %v1955_v45 = vld [vmem:[#allocation6 + $0x20] sm:$0xff]  }
  0x6d   :  { %526 = vmatprep.subr.bf16.mxu0 %v1779_v27  ;;  %v1888_v27 = vld [vmem:[#allocation4 + $0xc4] ss:$8 sps:$4 sm:$0xff]  }
  0x6e   :  { %566 = vmatpush1.bf16.msra.mxu1 %v1828_v48  ;;  %v161_v48 = vlaneseq }
  0x6f   :  { %567 = vmatprep.subr.bf16.mxu1 %v1829_v49 }
  0x70   :  { %527 = vmatpush1.bf16.msra.mxu0 %v1781_v30  ;;  %v1889_v30 = vld [vmem:[#allocation4 + $0xd0] ss:$8 sps:$4 sm:$0xff]   ;;  %v2201_v49 = vshrl.u32 %v161_v48, 7 }
  0x71   :  { %528 = vmatprep.subr.bf16.mxu0 %v1782_v31  ;;  %v1894_v31 = vld [vmem:[#allocation4 + $0xe4] ss:$8 sps:$4 sm:$0xff]   ;;  %v1960_v48 = vld [vmem:[#allocation6 + $0x78] sm:$0xff]  }
  0x72   :  { %568 = vmatpush1.bf16.msra.mxu1 %v1831_v52  ;;  %v167_v52 = vsub.s32 1, %v2201_v49 }
  0x73   :  { %569 = vmatprep.subr.bf16.mxu1 %v1832_v53 }
  0x74   :  { %529 = vmatpush1.bf16.msra.mxu0 %v1784_v34  ;;  %v1895_v34 = vld [vmem:[#allocation4 + $0xf0] ss:$8 sps:$4 sm:$0xff]  }
  0x75   :  { %530 = vmatprep.subr.bf16.mxu0 %v1785_v35  ;;  %v1900_v35 = vld [vmem:[#allocation4 + $0x104] ss:$8 sps:$4 sm:$0xff]  }
  0x76   :  { %570 = vmatpush1.bf16.msra.mxu1 %v1834_v55 }
  0x77   :  { %571 = vmatprep.subr.bf16.mxu1 %v1835_v57 }
  0x78   :  { %531 = vmatpush1.bf16.msra.mxu0 %v1787_v38  ;;  %v1948_v38 = vld [vmem:[#allocation6 + $0x48] sm:$0xff]  }
  0x79   :  { %532 = vmatprep.subr.bf16.mxu0 %v1788_v39  ;;  %v1949_v39 = vld [vmem:[#allocation6 + $0x8] sm:$0xff]  }
  0x7a   :  { %572 = vmatpush1.bf16.msra.mxu1 %v1837_v60 }
  0x7b   :  { %573 = vmatprep.subr.bf16.mxu1 %v1838_v62 }
  0x7c   :  { %533 = vmatpush1.bf16.msra.mxu0 %v1790_v42  ;;  %v1952_v42 = vld [vmem:[#allocation6 + $0x58] sm:$0xff]  }
  0x7d   :  { %534 = vmatprep.subr.bf16.mxu0 %v1791_v43  ;;  %v1953_v43 = vld [vmem:[#allocation6 + $0x18] sm:$0xff]  }
  0x7e   :  { %574 = vmatpush1.bf16.msra.mxu1 %v1840_v0  ;;  %v1898_v0 = vld [vmem:[#allocation4 + $0x100] ss:$8 sps:$4 sm:$0xff]  }
  0x7f   :  { %575 = vmatprep.subr.bf16.mxu1 %v1841_v2  ;;  %v1903_v2 = vld [vmem:[#allocation4 + $0x114] ss:$8 sps:$4 sm:$0xff]  }
  0x80   :  { %535 = vmatpush1.bf16.msra.mxu0 %v1793_v46  ;;  %v1956_v46 = vld [vmem:[#allocation6 + $0x68] sm:$0xff]  }
  0x81   :  { %536 = vmatprep.subr.bf16.mxu0 %v1794_v47  ;;  %v1957_v47 = vld [vmem:[#allocation6 + $0x28] sm:$0xff]  }
  0x82   :  { %576 = vmatpush1.bf16.msra.mxu1 %v1843_v4  ;;  %v1906_v4 = vld [vmem:[#allocation4 + $0x124] ss:$8 sps:$4 sm:$0xff]  }
  0x83   :  { %577 = vmatprep.subr.bf16.mxu1 %v1844_v6  ;;  %v1909_v6 = vld [vmem:[#allocation4 + $0x134] ss:$8 sps:$4 sm:$0xff]  }
  0x84   :  { %537 = vmatpush1.bf16.msra.mxu0 %v1796_v50  ;;  %v163_v50 = vsub.s32 0, %v2201_v49 }
  0x85   :  { %538 = vmatprep.subr.bf16.mxu0 %v1797_v51  ;;  %v2207_v51 = vld [vmem:[%s2283_s2] sm:$0xf] }
  0x86   :  { %578 = vmatpush1.bf16.msra.mxu1 %v1846_v8  ;;  %v164_v53 = vrot.slane %v2207_v51, %v163_v50  ;;  %v1907_v8 = vld [vmem:[#allocation4 + $0x130] ss:$8 sps:$4 sm:$0xff]  }
  0x87   :  { %579 = vmatprep.subr.bf16.mxu1 %v1847_v10 }
  0x88   :  { %539 = vmatpush1.bf16.msra.mxu0 %v1801_v54  ;;  %v168_v54 = vrot.slane %v2207_v51, %v167_v52 }
  0x89   :  { %994 = vmatprep.subr.bf16.mxu0 %v1852_v56 }
  0x8a   :  { %580 = vmatpush1.bf16.msra.mxu1 %v1849_v12  ;;  %v1910_v12 = vld [vmem:[#allocation4 + $0x140] ss:$8 sps:$4 sm:$0xff]  }
  0x8b   :  { %541 = vmatmul.mubr.bf16.vlgmr.msra.gmra.mrb[0].mxu0 %v1489_v59  ;;  %1654 = vmatprep.subr.bf16.mxu1 %v1946_v36  ;;  %v1939_v36 = vld [vmem:[#allocation4 + $0x1d4] ss:$8 sps:$4 sm:$0xff]  }
  0x8c   :  { %995 = vmatpush1.bf16.msra.mxu0 %v1850_v58 }
  0x8d   :  { %996 = vmatprep.subr.bf16.mxu0 %v1855_v61  ;;  %582 = vmatmul.mubr.bf16.vlgmr.msra.gmra.mrb[0].mxu1 %v1489_v59 }
  0x8e   :  { %1655 = vmatpush3.bf16.msra.mxu1 %v1947_v37  ;;  %v1937_v37 = vld [vmem:[#allocation4 + $0x1d0] ss:$8 sps:$4 sm:$0xff]  }
  0x8f   :  { %1656 = vmatprep.subr.bf16.mxu1 %v1948_v38 }
  0x90   :  { %997 = vmatpush1.bf16.msra.mxu0 %v1853_v63 }
  0x91   :  { %998 = vmatprep.subr.bf16.mxu0 %v1858_v1 }
  0x92   :  { %1657 = vmatpush3.bf16.msra.mxu1 %v1949_v39  ;;  %v1942_v39 = vld [vmem:[#allocation4 + $0x1e4] ss:$8 sps:$4 sm:$0xff]  }
  0x93   :  { %1658 = vmatprep.subr.bf16.mxu1 %v1950_v40  ;;  %v1940_v40 = vld [vmem:[#allocation4 + $0x1e0] ss:$8 sps:$4 sm:$0xff]  }
  0x94   :  { %999 = vmatpush1.bf16.msra.mxu0 %v1856_v3  ;;  %v1901_v3 = vld [vmem:[#allocation4 + $0x110] ss:$8 sps:$4 sm:$0xff]  }
  0x95   :  { %1000 = vmatprep.subr.bf16.mxu0 %v1861_v5  ;;  %v1904_v5 = vld [vmem:[#allocation4 + $0x120] ss:$8 sps:$4 sm:$0xff]  }
  0x96   :  { %1659 = vmatpush3.bf16.msra.mxu1 %v1951_v41 }
  0x97   :  { %1660 = vmatprep.subr.bf16.mxu1 %v1952_v42  ;;  %v1945_v42 = vld [vmem:[#allocation4 + $0x1f4] ss:$8 sps:$4 sm:$0xff]  }
  0x98   :  { %1001 = vmatpush1.bf16.msra.mxu0 %v1859_v7  ;;  %v175_v7 = vsub.s32 3, %v2201_v49 }
  0x99   :  { %1002 = vmatprep.subr.bf16.mxu0 %v1864_v9  ;;  %v1912_v9 = vld [vmem:[#allocation4 + $0x144] ss:$8 sps:$4 sm:$0xff]  }
  0x9a   :  { %1661 = vmatpush3.bf16.msra.mxu1 %v1953_v43  ;;  %v176_v10 = vrot.slane %v2207_v51, %v175_v7  ;;  %v1943_v43 = vld [vmem:[#allocation4 + $0x1f0] ss:$8 sps:$4 sm:$0xff]  }
  0x9b   :  { %1662 = vmatprep.subr.bf16.mxu1 %v1954_v44  ;;  %v1969_v7 = vld [vmem:[%s2288_s7 + $0x38] sm:$0xff]  }
  0x9c   :  { %1003 = vmatpush1.bf16.msra.mxu0 %v1862_v11 }
  0x9d   :  { %1004 = vmatprep.subr.bf16.mxu0 %v1867_v13 }
  0x9e   :  { %1663 = vmatpush3.bf16.msra.mxu1 %v1955_v45 }
  0x9f   :  { %1664 = vmatprep.subr.bf16.mxu1 %v1956_v46  ;;  %v1958_v46 = vld [vmem:[#allocation6 + $0x70] sm:$0xff]  }
  0xa0   :  { %1005 = vmatpush1.bf16.msra.mxu0 %v1865_v14  ;;  %v1915_v14 = vld [vmem:[#allocation4 + $0x154] ss:$8 sps:$4 sm:$0xff]  }
  0xa1   :  { %1006 = vmatprep.subr.bf16.mxu0 %v1870_v15 }
  0xa2   :  { %1665 = vmatpush3.bf16.msra.mxu1 %v1957_v47  ;;  %v1959_v47 = vld [vmem:[#allocation6 + $0x30] sm:$0xff]  }
  0xa3   :  { %1666 = vmatprep.subr.bf16.mxu1 %v1958_v46 }
  0xa4   :  { %1007 = vmatpush1.bf16.msra.mxu0 %v1868_v16 }
  0xa5   :  { %1008 = vmatprep.subr.bf16.mxu0 %v1873_v17 }
  0xa6   :  { %1667 = vmatpush3.bf16.msra.mxu1 %v1959_v47 }
  0xa7   :  { %1668 = vmatprep.subr.bf16.mxu1 %v1960_v48 }
  0xa8   :  { %1009 = vmatpush1.bf16.msra.mxu0 %v1871_v18 }
  0xa9   :  { %1010 = vmatprep.subr.bf16.mxu0 %v1876_v19  ;;  %v1913_v19 = vld [vmem:[#allocation4 + $0x150] ss:$8 sps:$4 sm:$0xff]  }
  0xac   :  { %1011 = vmatpush1.bf16.msra.mxu0 %v1874_v20  ;;  %v1918_v20 = vld [vmem:[#allocation4 + $0x164] ss:$8 sps:$4 sm:$0xff]  }
  0xad   :  { %1012 = vmatprep.subr.bf16.mxu0 %v1879_v21 }
  0xb0   :  { %1013 = vmatpush1.bf16.msra.mxu0 %v1877_v22  ;;  %v1916_v22 = vld [vmem:[#allocation4 + $0x160] ss:$8 sps:$4 sm:$0xff]  }
  0xb1   :  { %1014 = vmatprep.subr.bf16.mxu0 %v1882_v23  ;;  %v1921_v23 = vld [vmem:[#allocation4 + $0x174] ss:$8 sps:$4 sm:$0xff]  }
  0xb4   :  { %1015 = vmatpush1.bf16.msra.mxu0 %v1880_v24  ;;  %v1919_v24 = vld [vmem:[#allocation4 + $0x170] ss:$8 sps:$4 sm:$0xff]  }
  0xb5   :  { %1016 = vmatprep.subr.bf16.mxu0 %v1885_v25  ;;  %v1924_v25 = vld [vmem:[#allocation4 + $0x184] ss:$8 sps:$4 sm:$0xff]  }
  0xb8   :  { %1017 = vmatpush1.bf16.msra.mxu0 %v1883_v26  ;;  %v1922_v26 = vld [vmem:[#allocation4 + $0x180] ss:$8 sps:$4 sm:$0xff]  }
  0xb9   :  { %1018 = vmatprep.subr.bf16.mxu0 %v1888_v27  ;;  %v1927_v27 = vld [vmem:[#allocation4 + $0x194] ss:$8 sps:$4 sm:$0xff]  }
  0xbc   :  { %1019 = vmatpush1.bf16.msra.mxu0 %v1886_v28  ;;  %v1925_v28 = vld [vmem:[#allocation4 + $0x190] ss:$8 sps:$4 sm:$0xff]  }
  0xbd   :  { %1020 = vmatprep.subr.bf16.mxu0 %v1891_v29  ;;  %v1930_v29 = vld [vmem:[#allocation4 + $0x1a4] ss:$8 sps:$4 sm:$0xff]  }
  0xc0   :  { %1021 = vmatpush1.bf16.msra.mxu0 %v1889_v30  ;;  %v1928_v30 = vld [vmem:[#allocation4 + $0x1a0] ss:$8 sps:$4 sm:$0xff]  }
  0xc1   :  { %1022 = vmatprep.subr.bf16.mxu0 %v1894_v31  ;;  %v1933_v31 = vld [vmem:[#allocation4 + $0x1b4] ss:$8 sps:$4 sm:$0xff]  }
  0xc4   :  { %1023 = vmatpush1.bf16.msra.mxu0 %v1892_v32  ;;  %v1931_v32 = vld [vmem:[#allocation4 + $0x1b0] ss:$8 sps:$4 sm:$0xff]  }
  0xc5   :  { %1024 = vmatprep.subr.bf16.mxu0 %v1897_v33  ;;  %v1936_v33 = vld [vmem:[#allocation4 + $0x1c4] ss:$8 sps:$4 sm:$0xff]  }
  0xc8   :  { %1025 = vmatpush1.bf16.msra.mxu0 %v1895_v34  ;;  %v1934_v34 = vld [vmem:[#allocation4 + $0x1c0] ss:$8 sps:$4 sm:$0xff]  }
  0xc9   :  { %1035 = vmatprep.subr.bf16.mxu0 %v1900_v35  ;;  %v171_v35 = vsub.s32 2, %v2201_v49  ;;  %v1963_v49 = vld [vmem:[%s2288_s7 + $0x8] sm:$0xff]  }
  0xcb   :  { %v172_v38 = vrot.slane %v2207_v51, %v171_v35  ;;  %v1961_v51 = vld [vmem:[#allocation6 + $0x38] sm:$0xff]  }
  0xcc   :  { %1669 = vmatpush3.bf16.msra.mxu1 %v1961_v51 }
 0x15e   :  { %v542_v55 = vpop.f32.mrb[0].mxu0 }
 0x15f   :  { %v543_v56 = vadd.f32 %v542_v55, %v164_v53  ;;  %v544_v57 = vpop.f32.mrb[1].mxu0  ;;  %v2082_v53 = vmov 0.0  }
 0x160   :  { %v545_v58 = vadd.f32 %v544_v57, %v168_v54  ;;  %v546_v59 = vpop.f32.mrb[2].mxu0  ;;  %v583_v11 = vpop.f32.mrb[0].mxu1  ;;  %1694 = vmatprep.subr.bf16.mxu1 %v2082_v53  ;;  %v662_v54 = vld [vmem:[%s2285_s4] sm:$0x3] }
 0x161   :  { %v590_v60 = vmax.f32 %v543_v56, 0.0  ;;  %v547_v61 = vpop.f32.mrb[3].mxu0  ;;  %v585_v13 = vpop.f32.mrb[1].mxu1  ;;  %v584_v41 = vadd.f32 %v583_v11, %v172_v38  ;;  %v667_v55 = vrot.slane %v662_v54, %v163_v50  ;;  %v671_v56 = vrot.slane %v662_v54, %v167_v52  ;;  %v1964_v50 = vld [vmem:[%s2288_s7 + $0x10] sm:$0xff]   ;;  %v1965_v52 = vld [vmem:[%s2288_s7 + $0x18] sm:$0xff]  }
 0x162   :  { %v591_v62 = vmax.f32 %v545_v58, 0.0  ;;  %v586_v15 = vadd.f32 %v585_v13, %v176_v10  ;;  %v587_v16 = vpop.f32.mrb[2].mxu1 }
 0x163   :  { %v594_v1 = vpack.c.bf16 %v590_v60, %v590_v60  ;;  %v588_v17 = vpop.f32.mrb[3].mxu1  ;;  %v592_v44 = vmax.f32 %v584_v41, 0.0  ;;  %v1970_v16 = vld [vmem:[#allocation7] sm:$0xff]  }
 0x164   :  { %v595_v63 = vpack.c.bf16 %v591_v62, %v591_v62  ;;  %v593_v18 = vmax.f32 %v586_v15, 0.0 }
 0x165   :  { %v596_v45 = vpack.c.bf16 %v592_v44, %v592_v44 }
 0x166   :  { %1026 = vmatprep.mubr.bf16.mxu0 %v595_v63  ;;  %v597_v21 = vpack.c.bf16 %v593_v18, %v593_v18  ;;  %v1971_v18 = vld [vmem:[#allocation7 + $0x8] sm:$0xff]  }
 0x167   :  { %1027 = vmatmul.mubr.bf16.vlgmr.msra.gmra.mrb[4].mxu0 %v594_v1 }
 0x168   :  { %1036 = vmatpush1.bf16.msra.mxu0 %v1898_v0  ;;  %1067 = vmatprep.mubr.bf16.mxu0 %v597_v21  ;;  %v1974_v21 = vld [vmem:[#allocation7 + $0x20] sm:$0xff]  }
 0x169   :  { %1037 = vmatprep.subr.bf16.mxu0 %v1903_v2  ;;  %v1962_v2 = vld [vmem:[%s2288_s7] sm:$0xff]  }
 0x16c   :  { %1038 = vmatpush1.bf16.msra.mxu0 %v1901_v3 }
 0x16d   :  { %1039 = vmatprep.subr.bf16.mxu0 %v1906_v4  ;;  %v1966_v4 = vld [vmem:[%s2288_s7 + $0x20] sm:$0xff]  }
 0x170   :  { %1040 = vmatpush1.bf16.msra.mxu0 %v1904_v5  ;;  %v1967_v5 = vld [vmem:[%s2288_s7 + $0x28] sm:$0xff]  }
 0x171   :  { %1041 = vmatprep.subr.bf16.mxu0 %v1909_v6  ;;  %v1968_v6 = vld [vmem:[%s2288_s7 + $0x30] sm:$0xff]  }
 0x174   :  { %1042 = vmatpush1.bf16.msra.mxu0 %v1907_v8 }
 0x175   :  { %1043 = vmatprep.subr.bf16.mxu0 %v1912_v9  ;;  %v1619_v9 = vld [vmem:[%s2287_s6] ss:$0 sm:$0xff] }
 0x178   :  { %1044 = vmatpush1.bf16.msra.mxu0 %v1910_v12 }
 0x179   :  { %1045 = vmatprep.subr.bf16.mxu0 %v1915_v14 }
 0x17c   :  { %1046 = vmatpush1.bf16.msra.mxu0 %v1913_v19  ;;  %v1972_v19 = vld [vmem:[#allocation7 + $0x10] sm:$0xff]  }
 0x17d   :  { %1047 = vmatprep.subr.bf16.mxu0 %v1918_v20  ;;  %v1973_v20 = vld [vmem:[#allocation7 + $0x18] sm:$0xff]  }
 0x180   :  { %1048 = vmatpush1.bf16.msra.mxu0 %v1916_v22  ;;  %v1975_v22 = vld [vmem:[#allocation7 + $0x28] sm:$0xff]  }
 0x181   :  { %1049 = vmatprep.subr.bf16.mxu0 %v1921_v23  ;;  %v1976_v23 = vld [vmem:[#allocation7 + $0x30] sm:$0xff]  }
 0x184   :  { %1050 = vmatpush1.bf16.msra.mxu0 %v1919_v24  ;;  %v1977_v24 = vld [vmem:[#allocation7 + $0x38] sm:$0xff]  }
 0x185   :  { %1051 = vmatprep.subr.bf16.mxu0 %v1924_v25  ;;  %v1636_v25 = vld [vmem:[%s2289_s8] ss:$0 sm:$0xff] }
 0x188   :  { %1052 = vmatpush1.bf16.msra.mxu0 %v1922_v26 }
 0x189   :  { %1053 = vmatprep.subr.bf16.mxu0 %v1927_v27 }
 0x18c   :  { %1054 = vmatpush1.bf16.msra.mxu0 %v1925_v28 }
 0x18d   :  { %1055 = vmatprep.subr.bf16.mxu0 %v1930_v29 }
 0x190   :  { %1056 = vmatpush1.bf16.msra.mxu0 %v1928_v30 }
 0x191   :  { %1057 = vmatprep.subr.bf16.mxu0 %v1933_v31 }
 0x194   :  { %1058 = vmatpush1.bf16.msra.mxu0 %v1931_v32 }
 0x195   :  { %1059 = vmatprep.subr.bf16.mxu0 %v1936_v33  ;;  %v1645_v33 = vld [vmem:[%s2291_s10] ss:$0 sm:$0xff] }
 0x198   :  { %1060 = vmatpush1.bf16.msra.mxu0 %v1934_v34 }
 0x199   :  { %1061 = vmatprep.subr.bf16.mxu0 %v1939_v36 }
 0x19c   :  { %1062 = vmatpush1.bf16.msra.mxu0 %v1937_v37 }
 0x19d   :  { %1063 = vmatprep.subr.bf16.mxu0 %v1942_v39 }
 0x1a0   :  { %1064 = vmatpush1.bf16.msra.mxu0 %v1940_v40 }
 0x1a1   :  { %1065 = vmatprep.subr.bf16.mxu0 %v1945_v42 }
 0x1a4   :  { %1066 = vmatpush1.bf16.msra.mxu0 %v1943_v43 }
 0x1a7   :  { %1068 = vmatmul.mubr.bf16.vlgmr.msra.gmra.mrb[4].mxu0 %v596_v45 }
 0x27a   :  { %v1069_v57 = vpop.f32.mrb[4].mxu0 }
 0x27b   :  { %v1734_v58 = vadd.f32 %v1069_v57, %v667_v55  ;;  %v1071_v59 = vpop.f32.mrb[5].mxu0 }
 0x27c   :  { %v1735_v60 = vadd.f32 %v1071_v59, %v671_v56  ;;  %v1073_v61 = vpop.f32.mrb[6].mxu0 }
 0x27d   :  { %v1076_v62 = vmax.f32 %v1734_v58, 0.0  ;;  %v1074_v63 = vpop.f32.mrb[7].mxu0 }
 0x27e   :  { %v1077_v0 = vmax.f32 %v1735_v60, 0.0 }
 0x27f   :  { %v1078_v3 = vpack.c.bf16 %v1076_v62, %v1076_v62 }
 0x280   :  { %v1079_v1 = vpack.c.bf16 %v1077_v0, %v1077_v0 }
 0x282   :  { %1247 = vmatprep.mubr.bf16.mxu1 %v1079_v1 }
 0x283   :  { %1248 = vmatmul.mubr.bf16.vlgmr.msra.gmra.mrb[4].mxu1 %v1078_v3 }
 0x284   :  { %1695 = vmatpush3.bf16.msra.mxu1 %v1962_v2  ;;  %1710 = vmatprep.mubr.msk.bf16.mxu1 %vm2083_vm0, %v2082_v53 }
 0x285   :  { %1696 = vmatprep.subr.bf16.mxu1 %v2082_v53 }
 0x288   :  { %1697 = vmatpush3.bf16.msra.mxu1 %v1963_v49 }
 0x289   :  { %1698 = vmatprep.subr.bf16.mxu1 %v2082_v53 }
 0x28c   :  { %1699 = vmatpush3.bf16.msra.mxu1 %v1964_v50 }
 0x28d   :  { %1700 = vmatprep.subr.bf16.mxu1 %v2082_v53 }
 0x290   :  { %1701 = vmatpush3.bf16.msra.mxu1 %v1965_v52 }
 0x291   :  { %1702 = vmatprep.subr.bf16.mxu1 %v2082_v53 }
 0x294   :  { %1703 = vmatpush3.bf16.msra.mxu1 %v1966_v4 }
 0x295   :  { %1704 = vmatprep.subr.bf16.mxu1 %v2082_v53 }
 0x298   :  { %1705 = vmatpush3.bf16.msra.mxu1 %v1967_v5 }
 0x299   :  { %1706 = vmatprep.subr.bf16.mxu1 %v2082_v53 }
 0x29c   :  { %1707 = vmatpush3.bf16.msra.mxu1 %v1968_v6 }
 0x29d   :  { %1708 = vmatprep.subr.bf16.mxu1 %v2082_v53 }
 0x2a0   :  { %1709 = vmatpush3.bf16.msra.mxu1 %v1969_v7 }
 0x2a1   :  { %1714 = vmatprep.subr.bf16.mxu1 %v2082_v53 }
 0x356   :  { %v1670_v8 = vpop.f32.mrb[4].mxu1 }
 0x357   :  { %v1671_v10 = vpop.f32.mrb[5].mxu1 }
 0x358   :  { %v1672_v11 = vadd.f32 %v1671_v10, %v1670_v8  ;;  %v1673_v12 = vpop.f32.mrb[6].mxu1 }
 0x359   :  { %v1674_v13 = vpop.f32.mrb[7].mxu1 }
 0x35a   :  { %v1250_v14 = vadd.f32 %v1672_v11, %v1619_v9 }
 0x35c   :  { %v1255_v15 = vmax.f32 %v1250_v14, 0.0 }
 0x35e   :  { %v1256_v17 = vpack.c.bf16 %v1255_v15, %v1255_v15 }
 0x360   :  { %1711 = vmatmul.mubr.bf16.vlgmr.msra.gmra.mrb[8].mxu1 %v1256_v17 }
 0x361   :  { %1715 = vmatpush3.bf16.msra.mxu1 %v1970_v16  ;;  %1730 = vmatprep.mubr.msk.bf16.mxu1 %vm2083_vm0, %v2082_v53 }
 0x362   :  { %1716 = vmatprep.subr.bf16.mxu1 %v2082_v53 }
 0x365   :  { %1717 = vmatpush3.bf16.msra.mxu1 %v1971_v18 }
 0x366   :  { %1718 = vmatprep.subr.bf16.mxu1 %v2082_v53 }
 0x369   :  { %1719 = vmatpush3.bf16.msra.mxu1 %v1972_v19 }
 0x36a   :  { %1720 = vmatprep.subr.bf16.mxu1 %v2082_v53 }
 0x36d   :  { %1721 = vmatpush3.bf16.msra.mxu1 %v1973_v20 }
 0x36e   :  { %1722 = vmatprep.subr.bf16.mxu1 %v2082_v53 }
 0x371   :  { %1723 = vmatpush3.bf16.msra.mxu1 %v1974_v21 }
 0x372   :  { %1724 = vmatprep.subr.bf16.mxu1 %v2082_v53 }
 0x375   :  { %1725 = vmatpush3.bf16.msra.mxu1 %v1975_v22 }
 0x376   :  { %1726 = vmatprep.subr.bf16.mxu1 %v2082_v53 }
 0x379   :  { %1727 = vmatpush3.bf16.msra.mxu1 %v1976_v23 }
 0x37a   :  { %1728 = vmatprep.subr.bf16.mxu1 %v2082_v53 }
 0x37d   :  { %1729 = vmatpush3.bf16.msra.mxu1 %v1977_v24 }
 0x433   :  { %v1362_v26 = vpop.f32.mrb[8].mxu1 }
 0x434   :  { %v1363_v27 = vadd.f32 %v1636_v25, %v1362_v26  ;;  %v1712_v28 = vpop.f32.mrb[9].mxu1 }
 0x435   :  { %v1365_v29 = vpop.f32.mrb[10].mxu1 }
 0x436   :  { %v1368_v30 = vmax.f32 %v1363_v27, 0.0  ;;  %v1713_v31 = vpop.f32.mrb[11].mxu1 }
 0x438   :  { %v1369_v32 = vpack.c.bf16 %v1368_v30, %v1368_v30 }
 0x43a   :  { %1731 = vmatmul.mubr.bf16.vlgmr.msra.gmra.mrb[12].mxu1 %v1369_v32 }
 0x50d   :  { %v1475_v34 = vpop.f32.mrb[12].mxu1 }
 0x50e   :  { %v1476_v35 = vadd.f32 %v1645_v33, %v1475_v34  ;;  %v1732_v36 = vpop.f32.mrb[13].mxu1 }
 0x50f   :  { %v1478_v37 = vpop.f32.mrb[14].mxu1 }
 0x510   :  { %1481 = vst [vmem:[%s2292_s11] sm:$0xff] %v1476_v35  ;;  %v1733_v38 = vpop.f32.mrb[15].mxu1 }
 0x511   :  { %1486 = vsyncpa [#allocation3], 1 }
 0x512   :  { %1487 = vsyncpa [#allocation5], 1 }
 0x513   :  { %1488 = vsyncpa [#allocation8], 1 }

</bundles_post_ra>
